<compile_context>
chip_gen: v7x
topology: tpu7x:2x2x1
jax: 0.10.0
libtpu: 0.0.40
codegen_flags: <defaults>
</compile_context>

<pallas_src>
import jax
import jax.numpy as jnp
from jax.experimental import pallas as pl
from jax.experimental.pallas import tpu as pltpu

LANE = 128
SUBLANE = 8


# ----------------------------- Pallas kernel --------------------------------
def meanpool_kernel(slab_ref, w_ref, b_ref, o_ref):
    # Single lane-dense GEMM per node tile: (tn, K) @ (K, R) + (1, R).
    o_ref[...] = (jnp.dot(slab_ref[...], w_ref[...],
                          preferred_element_type=jnp.float32)
                  + b_ref[...]).astype(o_ref.dtype)


# ------------------------------ helpers --------------------------------------
def _round_up(v, m):
    return (v + m - 1) // m * m


def _choose_tile(n, k, r, *, max_tile=4096, min_rows=512, target_steps=8,
                 vmem_budget_bytes=20 << 20):
    """Pick the node-tile size: the largest multiple-of-8 divisor of n that
      (a) keeps the double-buffered, lane-padded input+output tiles inside
          `vmem_budget_bytes` (consistent with the 32 MiB vmem_limit_bytes and
          safe on v7x's 64 MiB physical VMEM), and
      (b) leaves >= `target_steps` grid steps (>= 4 per v7x TensorCore) as long
          as that still permits `min_rows`-row tiles, otherwise >= 2 steps."""
    # Per-row f32 VMEM bytes, lane-padded to 128, for slab + output; the x2 is
    # BlockSpec double-buffering of each.
    padded_row_bytes = 4 * (_round_up(k, LANE) + _round_up(r, LANE))
    vmem_cap = max(vmem_budget_bytes // (2 * padded_row_bytes), SUBLANE)

    if n >= 2 * SUBLANE:
        step_cap = max(n // target_steps, min(min_rows, n // 2))
    else:
        step_cap = n
    cap = min(max_tile, vmem_cap, step_cap)

    best = None
    t = SUBLANE
    while t <= cap:
        if n % t == 0:
            best = t
        t += SUBLANE
    # Fallback: no multiple-of-8 divisor fits -> single-step grid (no
    # pipelining, one idle v7x TensorCore).  Fine for tiny test shapes only.
    return best if best is not None else n


def _fold_weights(wn_t, bn, we_t, be, wr_t, br, d):
    """Fold node_layer / edge_layer / reduce_layer / mean into one (K, R) GEMM.

    Exact in real arithmetic:
      out = (x + sum_d x_src_d) @ (Wn^T Wrn)/(D+1)
          + (sum_d e_d)        @ (We^T Wre)/(D+1)
          + bn @ Wrn + (D/(D+1)) be @ Wre + br
    The node bias appears in all D+1 states; the edge bias only in the D real
    messages (the local state's edge half is exactly zero), hence D/(D+1).
    """
    fn, m2 = wn_t.shape
    fe = we_t.shape[0]
    m, r = wr_t.shape
    assert m == 2 * m2
    hi = jax.lax.Precision.HIGHEST

    wrn, wre = wr_t[:m2], wr_t[m2:]                        # node / edge row halves
    inv_dp1 = 1.0 / (d + 1)
    wn_fold = jnp.dot(wn_t, wrn, precision=hi) * inv_dp1   # (Fn, R)
    we_fold = jnp.dot(we_t, wre, precision=hi) * inv_dp1   # (Fe, R)

    # Slab layout per node: [ x (Fn) | x_src flattened d-major (D*Fn) |
    #                         e_feat flattened d-major (D*Fe) ]
    w_all = jnp.concatenate([jnp.tile(wn_fold, (d + 1, 1)),
                             jnp.tile(we_fold, (d, 1))], axis=0)       # (K, R)
    b_all = (jnp.dot(bn.reshape(1, m2), wrn, precision=hi)
             + (d * inv_dp1) * jnp.dot(be.reshape(1, m2), wre, precision=hi)
             + br.reshape(1, r))                                       # (1, R)
    return w_all, b_all


# ------------------------------ wrapper --------------------------------------
def mean_pool_forward(x, x_src, e_feat, wn_t, bn, we_t, be, wr_t, br, *, tn=None):
    n, fn = x.shape
    _, d, fe = e_feat.shape
    r = wr_t.shape[1]
    k = fn * (d + 1) + fe * d

    # Lane-dense input slab: one contiguous f32 row per node.
    slab = jnp.concatenate([x,
                            x_src.reshape(n, d * fn),
                            e_feat.reshape(n, d * fe)], axis=1)        # (n, K)
    w_all, b_all = _fold_weights(wn_t, bn, we_t, be, wr_t, br, d)

    if tn is None:
        tn = _choose_tile(n, k, r)
    assert n % tn == 0, "tn must divide N (tail masking not implemented)"

    flops = 2 * n * k * r + n * r
    bytes_accessed = 4 * (n * k + n * r + k * r + r)

    return pl.pallas_call(
        meanpool_kernel,
        out_shape=jax.ShapeDtypeStruct((n, r), jnp.float32),
        grid_spec=pltpu.PrefetchScalarGridSpec(
            num_scalar_prefetch=0,
            grid=(n // tn,),
            in_specs=[
                pl.BlockSpec((tn, k), lambda i: (i, 0)),   # node slab tile
                pl.BlockSpec((k, r), lambda i: (0, 0)),    # folded weights (resident)
                pl.BlockSpec((1, r), lambda i: (0, 0)),    # folded bias (resident)
            ],
            out_specs=pl.BlockSpec((tn, r), lambda i: (i, 0)),
        ),
        compiler_params=pltpu.CompilerParams(
            dimension_semantics=("parallel",),
            vmem_limit_bytes=32 * 1024 * 1024),
        cost_estimate=pl.CostEstimate(flops=flops, transcendentals=0,
                                      bytes_accessed=bytes_accessed),
    )(slab, w_all, b_all)


# ------------------------------ reference ------------------------------------
def mean_pool_reference(x, x_src, e_feat, wn_t, bn, we_t, be, wr_t, br):
    """Unfused reference, literal translation of the PyTorch/DGL layer."""
    hi = jax.lax.Precision.HIGHEST
    local_proj = jnp.dot(x, wn_t, precision=hi) + bn                     # (N, M2)
    src_proj = jnp.einsum('ndf,fm->ndm', x_src, wn_t, precision=hi) + bn
    edge_proj = jnp.einsum('ndf,fm->ndm', e_feat, we_t, precision=hi) + be
    messages = jnp.concatenate([src_proj, edge_proj], axis=-1)
    local_state = jnp.concatenate([local_proj, jnp.zeros_like(local_proj)], axis=-1)
    all_states = jnp.concatenate([local_state[:, None, :], messages], axis=1)
    embedded = jnp.einsum('ndm,mr->ndr', all_states, wr_t, precision=hi) + br
    return jnp.mean(embedded, axis=1)


def linear_init(key, out_f, in_f):
    """Deterministic init mimicking torch.nn.Linear default (uniform +-1/sqrt(fan_in))."""
    kw, kb = jax.random.split(key)
    bound = 1.0 / (in_f ** 0.5)
    w = jax.random.uniform(kw, (out_f, in_f), jnp.float32, -bound, bound)
    b = jax.random.uniform(kb, (out_f,), jnp.float32, -bound, bound)
    return w, b


# ------------------------------ main ------------------------------------------
if __name__ == "__main__":
    # module hyper-parameters
    in_features_node = 8      # Fn
    in_features_edge = 6      # Fe
    out_features_msg = 16     # M  (halves of 8)
    out_features_reduce = 32  # R

    N = 256  # number of nodes
    D = 8    # fixed in-degree per node (dense mailbox)

    M2 = out_features_msg // 2

    key = jax.random.PRNGKey(0)
    k_node, k_edge, k_wn, k_we, k_wr = jax.random.split(key, 5)

    # deterministic parameters (shapes from MeanPool.__init__)
    wn, bn = linear_init(k_wn, M2, in_features_node)                   # node_layer
    we, be = linear_init(k_we, M2, in_features_edge)                   # edge_layer
    wr, br = linear_init(k_wr, out_features_reduce, out_features_msg)  # reduce_layer

    # graph data
    x = jax.random.normal(k_node, (N, in_features_node), jnp.float32)          # node feats 'z'
    e_feat = jax.random.normal(k_edge, (N, D, in_features_edge), jnp.float32)  # edge feats 'z'
    # deterministic ring-like adjacency: node i receives from (i+1) .. (i+D)
    src_idx = (jnp.arange(N)[:, None] + jnp.arange(1, D + 1)[None, :]) % N     # (N, D)

    # glue: gather source-node features (graph indexing stays in plain JAX)
    x_src = x[src_idx]                                                         # (N, D, Fn)

    # kernel-friendly parameter layout (PyTorch nn.Linear: y = x @ W.T + b)
    wn_t = wn.T                       # (Fn, M2)
    we_t = we.T                       # (Fe, M2)
    wr_t = wr.T                       # (M, R)
    bn2 = bn.reshape(1, M2)
    be2 = be.reshape(1, M2)
    br2 = br.reshape(1, out_features_reduce)

    out = mean_pool_forward(x, x_src, e_feat, wn_t, bn2, we_t, be2, wr_t, br2)
    out = jax.block_until_ready(out)

    ref = mean_pool_reference(x, x_src, e_feat, wn_t, bn2, we_t, be2, wr_t, br2)
    assert out.shape == (N, out_features_reduce)
    # slightly looser than 1e-5: the host-side weight fold re-associates the
    # f32 GEMM chain (exact in real arithmetic, tiny fp drift).
    assert jnp.allclose(out, ref, atol=5e-5, rtol=5e-5), "mismatch vs reference"

    print("KERNEL_OK")
</pallas_src>

<mosaic_0001>
module attributes {stable_mosaic.version = 11 : i64} {
  func.func @meanpool_kernel(%arg0: i32, %arg1: memref<128x120xf32, #tpu.memory_space<vmem>>, %arg2: memref<120x32xf32, #tpu.memory_space<vmem>>, %arg3: memref<1x32xf32, #tpu.memory_space<vmem>>, %arg4: memref<128x32xf32, #tpu.memory_space<vmem>>) attributes {dimension_semantics = [#tpu.dimension_semantics<parallel>], iteration_bounds = array<i64: 2>, scalar_prefetch = 0 : i64, scratch_operands = 0 : i64, tpu.core_type = #tpu.core_type<tc>, window_params = [{transform_indices = @transform_0, window_bounds = array<i64: 128, 120>}, {pipeline_mode = #tpu.pipeline_mode<synchronous>, transform_indices = @transform_1, window_bounds = array<i64: 120, 32>}, {pipeline_mode = #tpu.pipeline_mode<synchronous>, transform_indices = @transform_2, window_bounds = array<i64: 1, 32>}, {transform_indices = @transform_3, window_bounds = array<i64: 128, 32>}]} {
    %c0 = arith.constant 0 : index
    %c0_0 = arith.constant 0 : index
    %0 = vector.load %arg1[%c0, %c0_0] : memref<128x120xf32, #tpu.memory_space<vmem>>, vector<128x120xf32>
    %c0_1 = arith.constant 0 : index
    %c0_2 = arith.constant 0 : index
    %1 = vector.load %arg2[%c0_1, %c0_2] : memref<120x32xf32, #tpu.memory_space<vmem>>, vector<120x32xf32>
    %cst = arith.constant dense<0.000000e+00> : vector<128x32xf32>
    %2 = tpu.matmul %0, %1, %cst {dimension_numbers = #tpu.dot_dimension_numbers<[1], [0], [0], [1], [0, 0, 1, 1], [], []>} : vector<128x120xf32>, vector<120x32xf32>, vector<128x32xf32> -> vector<128x32xf32>
    %c0_3 = arith.constant 0 : index
    %c0_4 = arith.constant 0 : index
    %3 = vector.load %arg3[%c0_3, %c0_4] : memref<1x32xf32, #tpu.memory_space<vmem>>, vector<1x32xf32>
    %4 = vector.broadcast %3 : vector<1x32xf32> to vector<128x32xf32>
    %5 = arith.addf %2, %4 : vector<128x32xf32>
    %c0_5 = arith.constant 0 : index
    %c0_6 = arith.constant 0 : index
    %6 = vector.load %arg4[%c0_5, %c0_6] : memref<128x32xf32, #tpu.memory_space<vmem>>, vector<128x32xf32>
    tpu.vector_store %arg4[%c0_5, %c0_6], %5 {strides = array<i32>} : memref<128x32xf32, #tpu.memory_space<vmem>>, vector<128x32xf32>,
    return
  }
  func.func @transform_0(%arg0: i32) -> (i32, i32) {
    %c0_i32 = arith.constant 0 : i32
    %c0_i32_0 = arith.constant 0 : i32
    return %arg0, %c0_i32 : i32, i32
  }
  func.func @transform_1(%arg0: i32) -> (i32, i32) {
    %c0_i32 = arith.constant 0 : i32
    %c0_i32_0 = arith.constant 0 : i32
    %c0_i32_1 = arith.constant 0 : i32
    return %c0_i32, %c0_i32_0 : i32, i32
  }
  func.func @transform_2(%arg0: i32) -> (i32, i32) {
    %c0_i32 = arith.constant 0 : i32
    %c0_i32_0 = arith.constant 0 : i32
    %c0_i32_1 = arith.constant 0 : i32
    return %c0_i32, %c0_i32_0 : i32, i32
  }
  func.func @transform_3(%arg0: i32) -> (i32, i32) {
    %c0_i32 = arith.constant 0 : i32
    %c0_i32_0 = arith.constant 0 : i32
    return %arg0, %c0_i32 : i32, i32
  }
}

</mosaic_0001>

<bundles_post_ra>
// kernel: tpu_custom_call.1
= control target key start
LH: loop header
LB: loop body
LE: loop exit
PB: predicated region body
PF: predicated region fallthrough
CT: control target
= control target key end

     0   :  { %s672_s12 = smov 0   ;;  %s812_s0 = inlined_call_operand.vmem [shape: f32[256,120], index: 0, kind: input, shape index: {}]   ;;  %s813_s1 = inlined_call_operand.vmem [shape: f32[120,32], index: 1, kind: input, shape index: {}]   ;;  %s814_s2 = inlined_call_operand.vmem [shape: f32[1,32], index: 2, kind: input, shape index: {}]   ;;  %s815_s3 = inlined_call_operand.vmem [shape: f32[256,32], index: 3, kind: output, shape index: {}]  }
   0x1 LB: > { %s479_s13 = sadd.s32 4294967295, %s650_s12   ;;  %p483_p0 = scmp.ge.s32.totalorder %s650_s12, 1  ;;  %s650_s12 = sphi %s672_s12, %s13_s12  }
   0x2   : > { %p138_p1 = scmp.lt.s32.totalorder %s650_s12, 3 }
   0x4   : > { %p139_p2 = pnand %p483_p0, %p138_p1 }
   0x5   : > { %v190_v0 = vld [vmem:[%s813_s1] sm:$0xff] (!%p139_p2)  ;;  %v191_v1 = vld [vmem:[%s813_s1 + $0x8] sm:$0xff] (!%p139_p2)  ;;  %v192_v2 = vld [vmem:[%s813_s1 + $0x10] sm:$0xff] (!%p139_p2)  ;;  %s484_s20 = sshll.u32 (!%p139_p2), %s479_s13, 4  ;;  %vm212_vm0 = vcmask (!%p139_p2), 982016   ;;  %vm406_vm1 = vcmask (!%p139_p2), 261120  }
   0x6   : > { %142 = sbr.rel (%p139_p2) target bundleno = 267 (0x10b), region = 32  ;;  %v592_v3 = vpack.c.bf16 (!%p139_p2), %v191_v1, %v190_v0  ;;  %v193_v4 = vld [vmem:[%s813_s1 + $0x18] sm:$0xff] (!%p139_p2)  ;;  %p163_p3 = scmp.lt.s32.totalorder (!%p139_p2), %s484_s20, 31  ;;  %v194_v6 = vld [vmem:[%s813_s1 + $0x20] sm:$0xff] (!%p139_p2)  ;;  %v195_v7 = vld [vmem:[%s813_s1 + $0x28] sm:$0xff] (!%p139_p2) }
   0x7   : > { %v596_v5 = vpack.c.bf16 (!%p139_p2), %v193_v4, %v192_v2  ;;  %v600_v8 = vpack.c.bf16 (!%p139_p2), %v195_v7, %v194_v6  ;;  %v196_v9 = vld [vmem:[%s813_s1 + $0x30] sm:$0xff] (!%p139_p2)  ;;  %v197_v10 = vld [vmem:[%s813_s1 + $0x38] sm:$0xff] (!%p139_p2)  ;;  %v198_v14 = vld [vmem:[%s813_s1 + $0x40] sm:$0xff] (!%p139_p2) }
   0x8   : > { %593 = vmatprep.subr.bf16.mxu0 (!%p139_p2), %v592_v3  ;;  %620 = vmatprep.subr.bf16.mxu1 (!%p139_p2), %v592_v3  ;;  %v604_v13 = vpack.c.bf16 (!%p139_p2), %v197_v10, %v196_v9  ;;  %v199_v15 = vld [vmem:[%s813_s1 + $0x48] sm:$0xff] (!%p139_p2)  ;;  %v200_v17 = vld [vmem:[%s813_s1 + $0x50] sm:$0xff] (!%p139_p2)  ;;  %v201_v18 = vld [vmem:[%s813_s1 + $0x58] sm:$0xff] (!%p139_p2) }
   0x9   : > { %595 = vmatpush3.bf16.msra.mxu0 (!%p139_p2), %v592_v3  ;;  %628 = vmatpush3.bf16.msra.mxu1 (!%p139_p2), %v592_v3  ;;  %v608_v16 = vpack.c.bf16 (!%p139_p2), %v199_v15, %v198_v14  ;;  %v612_v19 = vpack.c.bf16 (!%p139_p2), %v201_v18, %v200_v17  ;;  %v202_v20 = vld [vmem:[%s813_s1 + $0x60] sm:$0xff] (!%p139_p2)  ;;  %v203_v21 = vld [vmem:[%s813_s1 + $0x68] sm:$0xff] (!%p139_p2)  ;;  %v204_v23 = vld [vmem:[%s813_s1 + $0x70] sm:$0xff] (!%p139_p2) }
   0xa   : > { %597 = vmatprep.subr.bf16.mxu0 (!%p139_p2), %v596_v5  ;;  %621 = vmatprep.subr.bf16.mxu1 (!%p139_p2), %v596_v5  ;;  %v616_v22 = vpack.c.bf16 (!%p139_p2), %v203_v21, %v202_v20  ;;  %v488_v38 = vld [vmem:[%s814_s2] ss:$0 sm:$0xff] (!%p139_p2) }
   0xd   : > { %s817_s20 = smov (!%p163_p3, %s484_s20), 31  ;;  %599 = vmatpush3.bf16.msra.mxu0 %v596_v5  ;;  %629 = vmatpush3.bf16.msra.mxu1 %v596_v5 }
   0xe   : > { %s485_s27 = sshll.u32 %s817_s20, 3  ;;  %601 = vmatprep.subr.bf16.mxu0 %v600_v8  ;;  %622 = vmatprep.subr.bf16.mxu1 %v600_v8 }
   0xf   : > { %s712_s7 = scalar_lea.vmem %s812_s0, %s485_s27  ;;  %s775_s29 = scalar_lea.vmem %s815_s3, %s485_s27 }
  0x10   : > { %v174_v11 = vld [vmem:[%s712_s7] sm:$0xff]  ;;  %v175_v24 = vld [vmem:[%s712_s7 + $0x8] sm:$0xff]  ;;  %v176_v26 = vld [vmem:[%s712_s7 + $0x10] sm:$0xff] }
  0x11   : > { %v182_v12 = vld [vmem:[%s712_s7 + $0x40] sm:$0xff]  ;;  %568 = vmatprep.mubr.msk.f32.mxu0 %vm212_vm0, %v174_v11  ;;  %603 = vmatpush3.bf16.msra.mxu0 %v600_v8  ;;  %v183_v25 = vld [vmem:[%s712_s7 + $0x48] sm:$0xff]  ;;  %v184_v27 = vld [vmem:[%s712_s7 + $0x50] sm:$0xff] }
  0x12   : > { %580 = vmatprep.mubr.msk.f32.mxu1 %vm212_vm0, %v182_v12  ;;  %630 = vmatpush3.bf16.msra.mxu1 %v600_v8  ;;  %v177_v28 = vld [vmem:[%s712_s7 + $0x18] sm:$0xff]  ;;  %v178_v30 = vld [vmem:[%s712_s7 + $0x20] sm:$0xff]  ;;  %v179_v32 = vld [vmem:[%s712_s7 + $0x28] sm:$0xff] }
  0x13   : > { %605 = vmatprep.subr.bf16.mxu0 %v604_v13  ;;  %623 = vmatprep.subr.bf16.mxu1 %v604_v13  ;;  %v185_v29 = vld [vmem:[%s712_s7 + $0x58] sm:$0xff]  ;;  %v186_v31 = vld [vmem:[%s712_s7 + $0x60] sm:$0xff]  ;;  %v187_v33 = vld [vmem:[%s712_s7 + $0x68] sm:$0xff] }
  0x14   : > { %v180_v34 = vld [vmem:[%s712_s7 + $0x30] sm:$0xff]  ;;  %v181_v36 = vld [vmem:[%s712_s7 + $0x38] sm:$0xff] }
  0x15   : > { %607 = vmatpush3.bf16.msra.mxu0 %v604_v13  ;;  %v188_v35 = vld [vmem:[%s712_s7 + $0x70] sm:$0xff]  ;;  %v189_v37 = vld [vmem:[%s712_s7 + $0x78] sm:$0xff] }
  0x16   : > { %631 = vmatpush3.bf16.msra.mxu1 %v604_v13  ;;  %609 = vmatprep.subr.bf16.mxu0 %v608_v16 }
  0x17   : > { %624 = vmatprep.subr.bf16.mxu1 %v608_v16 }
  0x19   : > { %611 = vmatpush3.bf16.msra.mxu0 %v608_v16 }
  0x1a   : > { %632 = vmatpush3.bf16.msra.mxu1 %v608_v16  ;;  %613 = vmatprep.subr.bf16.mxu0 %v612_v19 }
  0x1b   : > { %625 = vmatprep.subr.bf16.mxu1 %v612_v19 }
  0x1d   : > { %615 = vmatpush3.bf16.msra.mxu0 %v612_v19 }
  0x1e   : > { %633 = vmatpush3.bf16.msra.mxu1 %v612_v19  ;;  %617 = vmatprep.subr.bf16.mxu0 %v616_v22 }
  0x1f   : > { %626 = vmatprep.subr.bf16.mxu1 %v616_v22 }
  0x21   : > { %619 = vmatpush3.bf16.msra.mxu0 %v616_v22 }
  0x22   : > { %634 = vmatpush3.bf16.msra.mxu1 %v616_v22  ;;  %566 = vmatprep.subr.mxu0 %v204_v23 }
  0x23   : > { %627 = vmatprep.subr.mxu1 %v204_v23 }
  0x25   : > { %567 = vmatpush3.msra.mxu0 %v204_v23 }
  0x26   : > { %635 = vmatpush3.msra.mxu1 %v204_v23  ;;  %569 = vmatmul.mubr.msk.f32.vlgmr.msra.gmra.mrb[0].mxu0 %vm212_vm0, %v175_v24 }
  0x27   : > { %581 = vmatmul.mubr.msk.f32.vlgmr.msra.gmra.mrb[0].mxu1 %vm212_vm0, %v183_v25  ;;  %571 = vmatprep.mubr.msk.f32.mxu0 %vm212_vm0, %v176_v26 }
  0x28   : > { %583 = vmatprep.mubr.msk.f32.mxu1 %vm212_vm0, %v184_v27 }
  0x2a   : > { %572 = vmatmul.mubr.msk.f32.gmra.mrb[2].mxu0 %vm212_vm0, %v177_v28 }
  0x2b   : > { %584 = vmatmul.mubr.msk.f32.gmra.mrb[2].mxu1 %vm212_vm0, %v185_v29  ;;  %574 = vmatprep.mubr.msk.f32.mxu0 %vm212_vm0, %v178_v30 }
  0x2c   : > { %586 = vmatprep.mubr.msk.f32.mxu1 %vm212_vm0, %v186_v31 }
  0x2e   : > { %575 = vmatmul.mubr.msk.f32.gmra.mrb[4].mxu0 %vm212_vm0, %v179_v32 }
  0x2f   : > { %587 = vmatmul.mubr.msk.f32.gmra.mrb[4].mxu1 %vm212_vm0, %v187_v33  ;;  %577 = vmatprep.mubr.msk.f32.mxu0 %vm212_vm0, %v180_v34 }
  0x30   : > { %589 = vmatprep.mubr.msk.f32.mxu1 %vm212_vm0, %v188_v35 }
  0x32   : > { %578 = vmatmul.mubr.msk.f32.gmra.mrb[6].mxu0 %vm212_vm0, %v181_v36 }
  0x33   : > { %590 = vmatmul.mubr.msk.f32.gmra.mrb[6].mxu1 %vm212_vm0, %v189_v37 }
  0xf9   : > { %v570_v39 = vpop.f32.mrb[0].mxu0 }
  0xfa   : > { %v582_v40 = vpop.f32.mrb[0].mxu1  ;;  %v333_v41 = vadd.f32 %v570_v39, %v488_v38  ;;  %v327_v43 = vpop.f32.mrb[1].mxu0 }
  0xfb   : > { %v373_v42 = vadd.f32 %v582_v40, %v488_v38  ;;  %v367_v44 = vpop.f32.mrb[1].mxu1  ;;  %v328_v45 = vadd.f32 %v488_v38, %v327_v43 }
  0xfc   : > { %v368_v46 = vadd.f32 %v488_v38, %v367_v44  ;;  %408 = vst.msk [vmem:[%s775_s29 + $0x8] sm:$0xff] %vm406_vm1, %v333_v41 }
  0xfd   : > { %416 = vst.msk [vmem:[%s775_s29 + $0x48] sm:$0xff] %vm406_vm1, %v373_v42  ;;  %407 = vst.msk [vmem:[%s775_s29] sm:$0xff] %vm406_vm1, %v328_v45  ;;  %v573_v47 = vpop.f32.mrb[2].mxu0 }
  0xfe   : > { %415 = vst.msk [vmem:[%s775_s29 + $0x40] sm:$0xff] %vm406_vm1, %v368_v46  ;;  %v585_v48 = vpop.f32.mrb[2].mxu1  ;;  %v343_v49 = vadd.f32 %v573_v47, %v488_v38  ;;  %v337_v51 = vpop.f32.mrb[3].mxu0 }
  0xff   : > { %v383_v50 = vadd.f32 %v585_v48, %v488_v38  ;;  %v377_v52 = vpop.f32.mrb[3].mxu1  ;;  %v338_v53 = vadd.f32 %v488_v38, %v337_v51 }
 0x100   : > { %v378_v54 = vadd.f32 %v488_v38, %v377_v52  ;;  %410 = vst.msk [vmem:[%s775_s29 + $0x18] sm:$0xff] %vm406_vm1, %v343_v49 }
 0x101   : > { %418 = vst.msk [vmem:[%s775_s29 + $0x58] sm:$0xff] %vm406_vm1, %v383_v50  ;;  %409 = vst.msk [vmem:[%s775_s29 + $0x10] sm:$0xff] %vm406_vm1, %v338_v53  ;;  %v576_v55 = vpop.f32.mrb[4].mxu0 }
 0x102   : > { %417 = vst.msk [vmem:[%s775_s29 + $0x50] sm:$0xff] %vm406_vm1, %v378_v54  ;;  %v588_v56 = vpop.f32.mrb[4].mxu1  ;;  %v353_v57 = vadd.f32 %v576_v55, %v488_v38  ;;  %v347_v59 = vpop.f32.mrb[5].mxu0 }
 0x103   : > { %v393_v58 = vadd.f32 %v588_v56, %v488_v38  ;;  %v387_v60 = vpop.f32.mrb[5].mxu1  ;;  %v348_v61 = vadd.f32 %v488_v38, %v347_v59 }
 0x104   : > { %v388_v62 = vadd.f32 %v488_v38, %v387_v60  ;;  %412 = vst.msk [vmem:[%s775_s29 + $0x28] sm:$0xff] %vm406_vm1, %v353_v57 }
 0x105   : > { %420 = vst.msk [vmem:[%s775_s29 + $0x68] sm:$0xff] %vm406_vm1, %v393_v58  ;;  %411 = vst.msk [vmem:[%s775_s29 + $0x20] sm:$0xff] %vm406_vm1, %v348_v61  ;;  %v579_v63 = vpop.f32.mrb[6].mxu0 }
 0x106   : > { %419 = vst.msk [vmem:[%s775_s29 + $0x60] sm:$0xff] %vm406_vm1, %v388_v62  ;;  %v591_v0 = vpop.f32.mrb[6].mxu1  ;;  %v363_v1 = vadd.f32 %v579_v63, %v488_v38  ;;  %v357_v3 = vpop.f32.mrb[7].mxu0 }
 0x107   : > { %v403_v2 = vadd.f32 %v591_v0, %v488_v38  ;;  %v397_v4 = vpop.f32.mrb[7].mxu1  ;;  %v358_v5 = vadd.f32 %v488_v38, %v357_v3 }
 0x108   : > { %v398_v6 = vadd.f32 %v488_v38, %v397_v4  ;;  %414 = vst.msk [vmem:[%s775_s29 + $0x38] sm:$0xff] %vm406_vm1, %v363_v1 }
 0x109   : > { %422 = vst.msk [vmem:[%s775_s29 + $0x78] sm:$0xff] %vm406_vm1, %v403_v2  ;;  %413 = vst.msk [vmem:[%s775_s29 + $0x30] sm:$0xff] %vm406_vm1, %v358_v5 }
 0x10a   : > { %421 = vst.msk [vmem:[%s775_s29 + $0x70] sm:$0xff] %vm406_vm1, %v398_v6 }
 0x10b PF: > { %s13_s12 = sadd.s32 1, %s650_s12  }
 0x10c   : > { %p10_p4 = scmp.ge.s32.totalorder %s13_s12, 4  }
 0x10e   :  { %12 = sbr.rel (!%p10_p4) target bundleno = 1 (0x1), region = 62 }

</bundles_post_ra>
